<compile_context>
chip_gen: v6e
topology: v6e:2x2x1
jax: 0.10.0
libtpu: 0.0.40
codegen_flags: <defaults>
</compile_context>

<pallas_src>
import jax
import jax.numpy as jnp
from jax.experimental import pallas as pl
from jax.experimental.pallas import tpu as pltpu


# ----------------------------- kernel -----------------------------

def autoencoder_kernel(
    x_ref,               # (tile_b, in_shape) bf16
    w1_ref, b1_ref,      # Linear(in, 128)
    w2_ref, b2_ref,      # Linear(128, 64)
    w34_ref, b34_ref,    # folded Linear(64,enc) -> BN(eval) -> Linear(enc,64)  == Linear(64,64)
    w5_ref, b5_ref,      # Linear(64, 128)
    w6_ref, b6_ref,      # Linear(128, in)
    out_ref,             # (tile_b, in_shape) f32
):
    x = x_ref[...]

    h = jnp.dot(x, w1_ref[...], preferred_element_type=jnp.float32) + b1_ref[...]
    h = jnp.maximum(h, 0.0)                      # ReLU (Dropout = identity in eval)

    h = jnp.dot(h.astype(jnp.bfloat16), w2_ref[...],
                preferred_element_type=jnp.float32) + b2_ref[...]
    h = jnp.maximum(h, 0.0)

    # encoder Linear(64,enc) -> BatchNorm1d(enc) -> decoder Linear(enc,64), pre-folded in wrapper
    h = jnp.dot(h.astype(jnp.bfloat16), w34_ref[...],
                preferred_element_type=jnp.float32) + b34_ref[...]
    h = jnp.maximum(h, 0.0)

    h = jnp.dot(h.astype(jnp.bfloat16), w5_ref[...],
                preferred_element_type=jnp.float32) + b5_ref[...]
    h = jnp.maximum(h, 0.0)

    y = jnp.dot(h.astype(jnp.bfloat16), w6_ref[...],
                preferred_element_type=jnp.float32) + b6_ref[...]

    out_ref[...] = y.astype(out_ref.dtype)


# ----------------------------- wrapper -----------------------------

_WEIGHT_KEYS = ("w1", "b1", "w2", "b2", "w34", "b34", "w5", "b5", "w6", "b6")


def _round_up(x, m):
    return (x + m - 1) // m * m


def prepare_kernel_params(params, eps=1e-5):
    """One-time preparation (hoisted out of the forward): fold Linear->BN(eval)->Linear into a
    single Linear(64,64) and cast weight matrices to bf16 (biases stay f32)."""
    scale = params["bn_gamma"] * jax.lax.rsqrt(params["bn_rvar"] + eps)          # (1, enc)
    w34 = (params["w3"] * scale) @ params["w4"]                                   # (64, 64)
    b34 = ((params["b3"] - params["bn_rmean"]) * scale + params["bn_beta"]) @ params["w4"] \
          + params["b4"]                                                           # (1, 64)

    def wb(w, b):
        return w.astype(jnp.bfloat16), b.reshape(1, -1).astype(jnp.float32)

    kp = {}
    kp["w1"], kp["b1"] = wb(params["w1"], params["b1"])
    kp["w2"], kp["b2"] = wb(params["w2"], params["b2"])
    kp["w34"], kp["b34"] = wb(w34, b34)
    kp["w5"], kp["b5"] = wb(params["w5"], params["b5"])
    kp["w6"], kp["b6"] = wb(params["w6"], params["b6"])
    return kp


def _select_batch_tiling(batch, target_tile=512):
    """Pick (padded_batch, tile_b, n_tiles): big lane-dense tiles (<=512 rows), >=2 grid steps
    whenever possible (so v7x's 2 TCs both get work), and minimal batch padding."""
    if batch <= 8:
        b = _round_up(max(batch, 1), 8)
        return b, b, 1
    n_tiles = max(2, -(-batch // target_tile))          # at least 2 tiles, tiles <= ~512 rows
    tile_b = _round_up(-(-batch // n_tiles), 16)        # 16: safe sublane granularity for bf16 input
    return n_tiles * tile_b, tile_b, n_tiles


@jax.jit
def autoencoder_forward(x, kp):
    """x: (B, in_shape) float32. kp: dict from prepare_kernel_params (bf16 weights, f32 biases)."""
    B, in_shape = x.shape
    b_final, tile_b, n_tiles = _select_batch_tiling(B)

    # Single fused pad+cast on the input (bf16 halves input HBM traffic; MXU consumes bf16 anyway).
    x_p = jnp.pad(x.astype(jnp.bfloat16), ((0, b_final - B), (0, 0)))

    if hasattr(pl, "Buffered"):
        # Constant-index blocks never change across grid steps -> single-buffer them.
        def weight_spec(shape):
            return pl.BlockSpec(shape, lambda i: (0, 0), pipeline_mode=pl.Buffered(1))
    else:  # older JAX fallback
        def weight_spec(shape):
            return pl.BlockSpec(shape, lambda i: (0, 0))

    in_specs = [pl.BlockSpec((tile_b, in_shape), lambda i: (i, 0))]
    for k in _WEIGHT_KEYS:
        in_specs.append(weight_spec(kp[k].shape))
    out_spec = pl.BlockSpec((tile_b, in_shape), lambda i: (i, 0))

    h1 = kp["w1"].shape[1]   # 128
    h2 = kp["w2"].shape[1]   # 64
    h5 = kp["w5"].shape[1]   # 128
    weight_bytes = sum(int(kp[k].size) * kp[k].dtype.itemsize for k in _WEIGHT_KEYS)
    flops = 2 * b_final * (in_shape * h1 + h1 * h2 + h2 * h2 + h2 * h5 + h5 * in_shape)
    bytes_accessed = int(b_final * in_shape * (2 + 4) + weight_bytes)   # bf16 in, f32 out, weights
    cost = pl.CostEstimate(flops=flops, transcendentals=0, bytes_accessed=bytes_accessed)

    out_p = pl.pallas_call(
        autoencoder_kernel,
        out_shape=jax.ShapeDtypeStruct((b_final, in_shape), jnp.float32),
        grid_spec=pltpu.PrefetchScalarGridSpec(
            num_scalar_prefetch=0,
            grid=(n_tiles,),
            in_specs=in_specs,
            out_specs=out_spec,
        ),
        compiler_params=pltpu.CompilerParams(
            dimension_semantics=("parallel",),   # shards batch tiles across v7x's 2 TCs
        ),
        cost_estimate=cost,
    )(
        x_p,
        kp["w1"], kp["b1"], kp["w2"], kp["b2"], kp["w34"], kp["b34"],
        kp["w5"], kp["b5"], kp["w6"], kp["b6"],
    )
    return out_p[:B]


# ----------------------------- params / reference -----------------------------

def init_params(key, in_shape, enc_shape):
    """Deterministic init mimicking the PyTorch module (weights stored as (fan_in, fan_out))."""
    dims = [
        (in_shape, 128),   # w1
        (128, 64),         # w2
        (64, enc_shape),   # w3
        (enc_shape, 64),   # w4
        (64, 128),         # w5
        (128, in_shape),   # w6
    ]
    params = {}
    keys = jax.random.split(key, 2 * len(dims))
    for i, (fi, fo) in enumerate(dims):
        bound = 1.0 / jnp.sqrt(jnp.float32(fi))  # torch nn.Linear default U(-1/sqrt(fan_in), ..)
        params[f"w{i+1}"] = jax.random.uniform(keys[2 * i], (fi, fo), jnp.float32, -bound, bound)
        params[f"b{i+1}"] = jax.random.uniform(keys[2 * i + 1], (1, fo), jnp.float32, -bound, bound)
    # BatchNorm1d(enc_shape) at torch init: gamma=1, beta=0, running_mean=0, running_var=1
    params["bn_gamma"] = jnp.ones((1, enc_shape), jnp.float32)
    params["bn_beta"] = jnp.zeros((1, enc_shape), jnp.float32)
    params["bn_rmean"] = jnp.zeros((1, enc_shape), jnp.float32)
    params["bn_rvar"] = jnp.ones((1, enc_shape), jnp.float32)
    return params


def reference_forward(x, p):
    """Pure-JAX f32 reference of the original module (eval mode)."""
    h = jnp.maximum(x @ p["w1"] + p["b1"], 0.0)
    h = jnp.maximum(h @ p["w2"] + p["b2"], 0.0)
    z = h @ p["w3"] + p["b3"]
    z = (z - p["bn_rmean"]) * jax.lax.rsqrt(p["bn_rvar"] + 1e-5) * p["bn_gamma"] + p["bn_beta"]
    h = jnp.maximum(z @ p["w4"] + p["b4"], 0.0)
    h = jnp.maximum(h @ p["w5"] + p["b5"], 0.0)
    return h @ p["w6"] + p["b6"]


if __name__ == "__main__":
    B = 8
    IN_SHAPE = 32
    ENC_SHAPE = 8

    key = jax.random.PRNGKey(0)
    kx, kparams = jax.random.split(key)
    x = jax.random.normal(kx, (B, IN_SHAPE), dtype=jnp.float32)
    params = init_params(kparams, IN_SHAPE, ENC_SHAPE)

    # One-time parameter preparation (hoisted out of the per-call forward).
    kp = jax.tree_util.tree_map(jax.block_until_ready, prepare_kernel_params(params))

    out = autoencoder_forward(x, kp)
    out = jax.block_until_ready(out)

    ref = reference_forward(x, params)
    assert out.shape == (B, IN_SHAPE)
    # bf16 MXU inputs with f32 accumulation -> ~1e-3..1e-2 abs error vs pure-f32 reference
    assert jnp.allclose(out, ref, atol=2e-2, rtol=2e-2), float(jnp.max(jnp.abs(out - ref)))

    print("KERNEL_OK")
</pallas_src>

<mosaic_0001>
module attributes {stable_mosaic.version = 11 : i64} {
  func.func @autoencoder_kernel(%arg0: i32, %arg1: memref<8x32xbf16, #tpu.memory_space<vmem>>, %arg2: memref<32x128xbf16, #tpu.memory_space<vmem>>, %arg3: memref<1x128xf32, #tpu.memory_space<vmem>>, %arg4: memref<128x64xbf16, #tpu.memory_space<vmem>>, %arg5: memref<1x64xf32, #tpu.memory_space<vmem>>, %arg6: memref<64x64xbf16, #tpu.memory_space<vmem>>, %arg7: memref<1x64xf32, #tpu.memory_space<vmem>>, %arg8: memref<64x128xbf16, #tpu.memory_space<vmem>>, %arg9: memref<1x128xf32, #tpu.memory_space<vmem>>, %arg10: memref<128x32xbf16, #tpu.memory_space<vmem>>, %arg11: memref<1x32xf32, #tpu.memory_space<vmem>>, %arg12: memref<8x32xf32, #tpu.memory_space<vmem>>) attributes {dimension_semantics = [#tpu.dimension_semantics<parallel>], iteration_bounds = array<i64: 1>, scalar_prefetch = 0 : i64, scratch_operands = 0 : i64, tpu.core_type = #tpu.core_type<tc>, window_params = [{transform_indices = @transform_0, window_bounds = array<i64: 8, 32>}, {pipeline_mode = #tpu.pipeline_mode<synchronous>, transform_indices = @transform_1, window_bounds = array<i64: 32, 128>}, {pipeline_mode = #tpu.pipeline_mode<synchronous>, transform_indices = @transform_2, window_bounds = array<i64: 1, 128>}, {pipeline_mode = #tpu.pipeline_mode<synchronous>, transform_indices = @transform_3, window_bounds = array<i64: 128, 64>}, {pipeline_mode = #tpu.pipeline_mode<synchronous>, transform_indices = @transform_4, window_bounds = array<i64: 1, 64>}, {pipeline_mode = #tpu.pipeline_mode<synchronous>, transform_indices = @transform_5, window_bounds = array<i64: 64, 64>}, {pipeline_mode = #tpu.pipeline_mode<synchronous>, transform_indices = @transform_6, window_bounds = array<i64: 1, 64>}, {pipeline_mode = #tpu.pipeline_mode<synchronous>, transform_indices = @transform_7, window_bounds = array<i64: 64, 128>}, {pipeline_mode = #tpu.pipeline_mode<synchronous>, transform_indices = @transform_8, window_bounds = array<i64: 1, 128>}, {pipeline_mode = #tpu.pipeline_mode<synchronous>, transform_indices = @transform_9, window_bounds = array<i64: 128, 32>}, {pipeline_mode = #tpu.pipeline_mode<synchronous>, transform_indices = @transform_10, window_bounds = array<i64: 1, 32>}, {transform_indices = @transform_11, window_bounds = array<i64: 8, 32>}]} {
    %c0 = arith.constant 0 : index
    %c0_0 = arith.constant 0 : index
    %0 = vector.load %arg1[%c0, %c0_0] : memref<8x32xbf16, #tpu.memory_space<vmem>>, vector<8x32xbf16>
    %c0_1 = arith.constant 0 : index
    %c0_2 = arith.constant 0 : index
    %1 = vector.load %arg2[%c0_1, %c0_2] : memref<32x128xbf16, #tpu.memory_space<vmem>>, vector<32x128xbf16>
    %cst = arith.constant dense<0.000000e+00> : vector<8x128xf32>
    %2 = tpu.matmul %0, %1, %cst {dimension_numbers = #tpu.dot_dimension_numbers<[1], [0], [0], [1], [0, 0, 1, 1], [], []>} : vector<8x32xbf16>, vector<32x128xbf16>, vector<8x128xf32> -> vector<8x128xf32>
    %c0_3 = arith.constant 0 : index
    %c0_4 = arith.constant 0 : index
    %3 = vector.load %arg3[%c0_3, %c0_4] : memref<1x128xf32, #tpu.memory_space<vmem>>, vector<1x128xf32>
    %4 = vector.broadcast %3 : vector<1x128xf32> to vector<8x128xf32>
    %5 = arith.addf %2, %4 : vector<8x128xf32>
    %cst_5 = arith.constant 0.000000e+00 : f32
    %6 = vector.broadcast %cst_5 : f32 to vector<8x128xf32>
    %7 = arith.maximumf %5, %6 : vector<8x128xf32>
    %8 = arith.truncf %7 : vector<8x128xf32> to vector<8x128xbf16>
    %c0_6 = arith.constant 0 : index
    %c0_7 = arith.constant 0 : index
    %9 = vector.load %arg4[%c0_6, %c0_7] : memref<128x64xbf16, #tpu.memory_space<vmem>>, vector<128x64xbf16>
    %cst_8 = arith.constant dense<0.000000e+00> : vector<8x64xf32>
    %10 = tpu.matmul %8, %9, %cst_8 {dimension_numbers = #tpu.dot_dimension_numbers<[1], [0], [0], [1], [0, 0, 1, 1], [], []>} : vector<8x128xbf16>, vector<128x64xbf16>, vector<8x64xf32> -> vector<8x64xf32>
    %c0_9 = arith.constant 0 : index
    %c0_10 = arith.constant 0 : index
    %11 = vector.load %arg5[%c0_9, %c0_10] : memref<1x64xf32, #tpu.memory_space<vmem>>, vector<1x64xf32>
    %12 = vector.broadcast %11 : vector<1x64xf32> to vector<8x64xf32>
    %13 = arith.addf %10, %12 : vector<8x64xf32>
    %cst_11 = arith.constant 0.000000e+00 : f32
    %14 = vector.broadcast %cst_11 : f32 to vector<8x64xf32>
    %15 = arith.maximumf %13, %14 : vector<8x64xf32>
    %16 = arith.truncf %15 : vector<8x64xf32> to vector<8x64xbf16>
    %c0_12 = arith.constant 0 : index
    %c0_13 = arith.constant 0 : index
    %17 = vector.load %arg6[%c0_12, %c0_13] : memref<64x64xbf16, #tpu.memory_space<vmem>>, vector<64x64xbf16>
    %cst_14 = arith.constant dense<0.000000e+00> : vector<8x64xf32>
    %18 = tpu.matmul %16, %17, %cst_14 {dimension_numbers = #tpu.dot_dimension_numbers<[1], [0], [0], [1], [0, 0, 1, 1], [], []>} : vector<8x64xbf16>, vector<64x64xbf16>, vector<8x64xf32> -> vector<8x64xf32>
    %c0_15 = arith.constant 0 : index
    %c0_16 = arith.constant 0 : index
    %19 = vector.load %arg7[%c0_15, %c0_16] : memref<1x64xf32, #tpu.memory_space<vmem>>, vector<1x64xf32>
    %20 = vector.broadcast %19 : vector<1x64xf32> to vector<8x64xf32>
    %21 = arith.addf %18, %20 : vector<8x64xf32>
    %cst_17 = arith.constant 0.000000e+00 : f32
    %22 = vector.broadcast %cst_17 : f32 to vector<8x64xf32>
    %23 = arith.maximumf %21, %22 : vector<8x64xf32>
    %24 = arith.truncf %23 : vector<8x64xf32> to vector<8x64xbf16>
    %c0_18 = arith.constant 0 : index
    %c0_19 = arith.constant 0 : index
    %25 = vector.load %arg8[%c0_18, %c0_19] : memref<64x128xbf16, #tpu.memory_space<vmem>>, vector<64x128xbf16>
    %cst_20 = arith.constant dense<0.000000e+00> : vector<8x128xf32>
    %26 = tpu.matmul %24, %25, %cst_20 {dimension_numbers = #tpu.dot_dimension_numbers<[1], [0], [0], [1], [0, 0, 1, 1], [], []>} : vector<8x64xbf16>, vector<64x128xbf16>, vector<8x128xf32> -> vector<8x128xf32>
    %c0_21 = arith.constant 0 : index
    %c0_22 = arith.constant 0 : index
    %27 = vector.load %arg9[%c0_21, %c0_22] : memref<1x128xf32, #tpu.memory_space<vmem>>, vector<1x128xf32>
    %28 = vector.broadcast %27 : vector<1x128xf32> to vector<8x128xf32>
    %29 = arith.addf %26, %28 : vector<8x128xf32>
    %cst_23 = arith.constant 0.000000e+00 : f32
    %30 = vector.broadcast %cst_23 : f32 to vector<8x128xf32>
    %31 = arith.maximumf %29, %30 : vector<8x128xf32>
    %32 = arith.truncf %31 : vector<8x128xf32> to vector<8x128xbf16>
    %c0_24 = arith.constant 0 : index
    %c0_25 = arith.constant 0 : index
    %33 = vector.load %arg10[%c0_24, %c0_25] : memref<128x32xbf16, #tpu.memory_space<vmem>>, vector<128x32xbf16>
    %cst_26 = arith.constant dense<0.000000e+00> : vector<8x32xf32>
    %34 = tpu.matmul %32, %33, %cst_26 {dimension_numbers = #tpu.dot_dimension_numbers<[1], [0], [0], [1], [0, 0, 1, 1], [], []>} : vector<8x128xbf16>, vector<128x32xbf16>, vector<8x32xf32> -> vector<8x32xf32>
    %c0_27 = arith.constant 0 : index
    %c0_28 = arith.constant 0 : index
    %35 = vector.load %arg11[%c0_27, %c0_28] : memref<1x32xf32, #tpu.memory_space<vmem>>, vector<1x32xf32>
    %36 = vector.broadcast %35 : vector<1x32xf32> to vector<8x32xf32>
    %37 = arith.addf %34, %36 : vector<8x32xf32>
    %c0_29 = arith.constant 0 : index
    %c0_30 = arith.constant 0 : index
    %38 = vector.load %arg12[%c0_29, %c0_30] : memref<8x32xf32, #tpu.memory_space<vmem>>, vector<8x32xf32>
    tpu.vector_store %arg12[%c0_29, %c0_30], %37 {strides = array<i32>} : memref<8x32xf32, #tpu.memory_space<vmem>>, vector<8x32xf32>,
    return
  }
  func.func @transform_0(%arg0: i32) -> (i32, i32) {
    %c0_i32 = arith.constant 0 : i32
    %c0_i32_0 = arith.constant 0 : i32
    return %arg0, %c0_i32 : i32, i32
  }
  func.func @transform_1(%arg0: i32) -> (i32, i32) {
    %c0_i32 = arith.constant 0 : i32
    %c0_i32_0 = arith.constant 0 : i32
    %c0_i32_1 = arith.constant 0 : i32
    return %c0_i32, %c0_i32_0 : i32, i32
  }
  func.func @transform_2(%arg0: i32) -> (i32, i32) {
    %c0_i32 = arith.constant 0 : i32
    %c0_i32_0 = arith.constant 0 : i32
    %c0_i32_1 = arith.constant 0 : i32
    return %c0_i32, %c0_i32_0 : i32, i32
  }
  func.func @transform_3(%arg0: i32) -> (i32, i32) {
    %c0_i32 = arith.constant 0 : i32
    %c0_i32_0 = arith.constant 0 : i32
    %c0_i32_1 = arith.constant 0 : i32
    return %c0_i32, %c0_i32_0 : i32, i32
  }
  func.func @transform_4(%arg0: i32) -> (i32, i32) {
    %c0_i32 = arith.constant 0 : i32
    %c0_i32_0 = arith.constant 0 : i32
    %c0_i32_1 = arith.constant 0 : i32
    return %c0_i32, %c0_i32_0 : i32, i32
  }
  func.func @transform_5(%arg0: i32) -> (i32, i32) {
    %c0_i32 = arith.constant 0 : i32
    %c0_i32_0 = arith.constant 0 : i32
    %c0_i32_1 = arith.constant 0 : i32
    return %c0_i32, %c0_i32_0 : i32, i32
  }
  func.func @transform_6(%arg0: i32) -> (i32, i32) {
    %c0_i32 = arith.constant 0 : i32
    %c0_i32_0 = arith.constant 0 : i32
    %c0_i32_1 = arith.constant 0 : i32
    return %c0_i32, %c0_i32_0 : i32, i32
  }
  func.func @transform_7(%arg0: i32) -> (i32, i32) {
    %c0_i32 = arith.constant 0 : i32
    %c0_i32_0 = arith.constant 0 : i32
    %c0_i32_1 = arith.constant 0 : i32
    return %c0_i32, %c0_i32_0 : i32, i32
  }
  func.func @transform_8(%arg0: i32) -> (i32, i32) {
    %c0_i32 = arith.constant 0 : i32
    %c0_i32_0 = arith.constant 0 : i32
    %c0_i32_1 = arith.constant 0 : i32
    return %c0_i32, %c0_i32_0 : i32, i32
  }
  func.func @transform_9(%arg0: i32) -> (i32, i32) {
    %c0_i32 = arith.constant 0 : i32
    %c0_i32_0 = arith.constant 0 : i32
    %c0_i32_1 = arith.constant 0 : i32
    return %c0_i32, %c0_i32_0 : i32, i32
  }
  func.func @transform_10(%arg0: i32) -> (i32, i32) {
    %c0_i32 = arith.constant 0 : i32
    %c0_i32_0 = arith.constant 0 : i32
    %c0_i32_1 = arith.constant 0 : i32
    return %c0_i32, %c0_i32_0 : i32, i32
  }
  func.func @transform_11(%arg0: i32) -> (i32, i32) {
    %c0_i32 = arith.constant 0 : i32
    %c0_i32_0 = arith.constant 0 : i32
    return %arg0, %c0_i32 : i32, i32
  }
}

</mosaic_0001>

<bundles_post_ra>
// kernel: autoencoder_forward.1
= control target key start
LH: loop header
LB: loop body
LE: loop exit
PB: predicated region body
PF: predicated region fallthrough
CT: control target
= control target key end

     0   :  { %v706_v1 = vmov 0.0   ;;  %vm707_vm0 = vmmov 0   ;;  %vm64_vm1 = vcmask 261120   ;;  %s908_s0 = inlined_call_operand.vmem [shape: bf16[8,32], index: 0, kind: input, shape index: {}]   ;;  %s909_s1 = inlined_call_operand.vmem [shape: bf16[32,128], index: 1, kind: input, shape index: {}]   ;;  %s910_s2 = inlined_call_operand.vmem [shape: f32[1,128], index: 2, kind: input, shape index: {}]   ;;  %s911_s3 = inlined_call_operand.vmem [shape: bf16[128,64], index: 3, kind: input, shape index: {}]   ;;  %s912_s4 = inlined_call_operand.vmem [shape: f32[1,64], index: 4, kind: input, shape index: {}]   ;;  %s913_s5 = inlined_call_operand.vmem [shape: bf16[64,64], index: 5, kind: input, shape index: {}]   ;;  %s914_s6 = inlined_call_operand.vmem [shape: f32[1,64], index: 6, kind: input, shape index: {}]   ;;  %s915_s7 = inlined_call_operand.vmem [shape: bf16[64,128], index: 7, kind: input, shape index: {}]   ;;  %s916_s8 = inlined_call_operand.vmem [shape: f32[1,128], index: 8, kind: input, shape index: {}]   ;;  %s917_s9 = inlined_call_operand.vmem [shape: bf16[128,32], index: 9, kind: input, shape index: {}]   ;;  %s918_s10 = inlined_call_operand.vmem [shape: f32[1,32], index: 10, kind: input, shape index: {}]   ;;  %s919_s11 = inlined_call_operand.hbm [shape: f32[8,32], index: 11, kind: output, shape index: {}]  }
   0x1   :  { %v658_v0 = vld [vmem:[%s909_s1 + $0x8] sm:$0xff]   ;;  %583 = vmatprep.subr.bf16.mxu0 %v706_v1  ;;  %591 = vmatprep.subr.bf16.mxu1 %v706_v1  ;;  %v659_v2 = vld [vmem:[%s909_s1] sm:$0xff]   ;;  %v660_v3 = vld [vmem:[%s911_s3 + $0x38] sm:$0xff]  }
   0x2   :  { %584 = vmatpush3.bf16.msra.mxu0 %v658_v0  ;;  %587 = vmatprep.mubr.msk.bf16.mxu0 %vm707_vm0, %v706_v1  ;;  %v661_v4 = vld [vmem:[%s911_s3 + $0x30] sm:$0xff]   ;;  %v40_v5 = vld [vmem:[%s908_s0] sm:$0xf]  ;;  %v662_v6 = vld [vmem:[%s911_s3 + $0x28] sm:$0xff]  }
   0x3   :  { %585 = vmatprep.subr.bf16.mxu0 %v706_v1  ;;  %607 = vmatprep.mubr.msk.bf16.mxu1 %vm707_vm0, %v706_v1  ;;  %v663_v7 = vld [vmem:[%s911_s3 + $0x20] sm:$0xff]   ;;  %v664_v8 = vld [vmem:[%s911_s3 + $0x18] sm:$0xff]   ;;  %v665_v9 = vld [vmem:[%s911_s3 + $0x10] sm:$0xff]  }
   0x4   :  { %592 = vmatpush3.bf16.msra.mxu1 %v660_v3 }
   0x5   :  { %593 = vmatprep.subr.bf16.mxu1 %v706_v1 }
   0x6   :  { %586 = vmatpush3.bf16.msra.mxu0 %v659_v2 }
   0x7   :  { %611 = vmatprep.subr.bf16.mxu0 %v706_v1 }
   0x8   :  { %594 = vmatpush3.bf16.msra.mxu1 %v661_v4 }
   0x9   :  { %588 = vmatmul.mubr.msk.bf16.vlgmr.msra.gmra.mxu0 %vm64_vm1, %v40_v5  ;;  %595 = vmatprep.subr.bf16.mxu1 %v706_v1 }
   0xa   :  { %619 = vmatprep.mubr.msk.bf16.mxu0 %vm707_vm0, %v706_v1 }
   0xc   :  { %596 = vmatpush3.bf16.msra.mxu1 %v662_v6 }
   0xd   :  { %597 = vmatprep.subr.bf16.mxu1 %v706_v1 }
  0x10   :  { %598 = vmatpush3.bf16.msra.mxu1 %v663_v7 }
  0x11   :  { %599 = vmatprep.subr.bf16.mxu1 %v706_v1 }
  0x14   :  { %600 = vmatpush3.bf16.msra.mxu1 %v664_v8 }
  0x15   :  { %16 = vsyncpa [#allocation3], 0  ;;  %601 = vmatprep.subr.bf16.mxu1 %v706_v1  ;;  %v666_v10 = vld [vmem:[%s911_s3 + $0x8] sm:$0xff]   ;;  %v667_v11 = vld [vmem:[%s911_s3] sm:$0xff]   ;;  %vm262_vm2 = vcmask 523264   ;;  %s708_s29 = smov [#allocation2]  }
  0x16   :  { %v668_v12 = vld [vmem:[%s913_s5 + $0x18] sm:$0xff]   ;;  %v669_v13 = vld [vmem:[%s913_s5 + $0x10] sm:$0xff]   ;;  %v518_v14 = vld [vmem:[%s910_s2] ss:$0 sm:$0xff] }
  0x17   :  { %612 = vmatpush3.bf16.msra.mxu0 %v668_v12  ;;  %v670_v22 = vld [vmem:[%s913_s5 + $0x8] sm:$0xff]   ;;  %v671_v23 = vld [vmem:[%s913_s5] sm:$0xff]   ;;  %v672_v30 = vld [vmem:[%s915_s7 + $0x18] sm:$0xff]  }
  0x18   :  { %602 = vmatpush3.bf16.msra.mxu1 %v665_v9  ;;  %613 = vmatprep.subr.bf16.mxu0 %v706_v1  ;;  %v522_v24 = vld [vmem:[%s912_s4] ss:$0 sm:$0xff]  ;;  %v673_v33 = vld [vmem:[%s915_s7 + $0x10] sm:$0xff]   ;;  %v674_v34 = vld [vmem:[%s915_s7 + $0x8] sm:$0xff]   ;;  %s510_s4 = sshll.u32 %s708_s29, 4  ;;  %s511_s4 = int_to_ptr.vmem [resolvable:$true] %s510_s4 }
  0x19   :  { %603 = vmatprep.subr.bf16.mxu1 %v706_v1  ;;  %v675_v35 = vld [vmem:[%s915_s7] sm:$0xff]   ;;  %v676_v36 = vld [vmem:[%s917_s9 + $0x38] sm:$0xff]   ;;  %v677_v37 = vld [vmem:[%s917_s9 + $0x30] sm:$0xff]   ;;  %p689_p1 = scmp.lt.s32.totalorder %s511_s4, %s511_s4 }
  0x1a   :  { %v678_v38 = vld [vmem:[%s917_s9 + $0x28] sm:$0xff]   ;;  %v679_v39 = vld [vmem:[%s917_s9 + $0x20] sm:$0xff]   ;;  %v680_v40 = vld [vmem:[%s917_s9 + $0x18] sm:$0xff]  }
  0x1b   :  { %614 = vmatpush3.bf16.msra.mxu0 %v669_v13  ;;  %v681_v41 = vld [vmem:[%s917_s9 + $0x10] sm:$0xff]   ;;  %v531_v42 = vld [vmem:[%s914_s6] ss:$0 sm:$0xff]  ;;  %v682_v50 = vld [vmem:[%s917_s9 + $0x8] sm:$0xff]  }
  0x1c   :  { %604 = vmatpush3.bf16.msra.mxu1 %v666_v10  ;;  %615 = vmatprep.subr.bf16.mxu0 %v706_v1  ;;  %v683_v51 = vld [vmem:[%s917_s9] sm:$0xff]  }
  0x1d   :  { %605 = vmatprep.subr.bf16.mxu1 %v706_v1  ;;  %v537_v52 = vld [vmem:[%s916_s8] ss:$0 sm:$0xff]  ;;  %s684_s8 = scalar_lea.vmem %s511_s4, 128 }
  0x1e   :  { %v543_v60 = vld [vmem:[%s918_s10] ss:$0 sm:$0xff]  ;;  %p685_p0 = scmp.ne.s32.totalorder %s511_s4, %s684_s8  ;;  %p690_p2 = scmp.lt.s32.totalorder %s684_s8, %s684_s8 }
  0x1f   :  { %616 = vmatpush3.bf16.msra.mxu0 %v670_v22 }
  0x20   :  { %606 = vmatpush3.bf16.msra.mxu1 %v667_v11  ;;  %617 = vmatprep.subr.bf16.mxu0 %v706_v1  ;;  %p691_p3 = por %p690_p2, %p689_p1 }
  0x21   :  { %635 = vmatprep.subr.bf16.mxu1 %v706_v1 }
  0x22   :  { %p692_p4 = pnand %p691_p3, %p685_p0 }
  0x23   :  { %618 = vmatpush3.bf16.msra.mxu0 %v671_v23 }
  0x24   :  { %623 = vmatprep.subr.bf16.mxu0 %v706_v1 }
  0xc9   :  { %v102_v15 = vpop.f32.mrf.mxu0 }
  0xca   :  { %v103_v16 = vadd.f32 %v518_v14, %v102_v15 }
  0xcb   :  { %v589_v17 = vpop.f32.mrf.mxu0 }
  0xcc   :  { %v108_v18 = vmax.f32 %v103_v16, 0.0 }
  0xcd   :  { %v105_v19 = vpop.f32.mrf.mxu0 }
  0xce   :  { %v109_v20 = vpack.c.bf16 %v108_v18, %v108_v18 }
  0xcf   :  { %v590_v21 = vpop.f32.mrf.mxu0 }
  0xd0   :  { %608 = vmatmul.mubr.bf16.vlgmr.msra.gmra.mxu1 %v109_v20 }
  0xd1   :  { %651 = vmatprep.mubr.msk.bf16.mxu1 %vm707_vm0, %v706_v1  ;;  %636 = vmatpush3.bf16.msra.mxu1 %v676_v36 }
  0xd2   :  { %637 = vmatprep.subr.bf16.mxu1 %v706_v1 }
  0xd5   :  { %638 = vmatpush3.bf16.msra.mxu1 %v677_v37 }
  0xd6   :  { %639 = vmatprep.subr.bf16.mxu1 %v706_v1 }
  0xd9   :  { %640 = vmatpush3.bf16.msra.mxu1 %v678_v38 }
  0xda   :  { %641 = vmatprep.subr.bf16.mxu1 %v706_v1 }
  0xdd   :  { %642 = vmatpush3.bf16.msra.mxu1 %v679_v39 }
  0xde   :  { %643 = vmatprep.subr.bf16.mxu1 %v706_v1 }
  0xe1   :  { %644 = vmatpush3.bf16.msra.mxu1 %v680_v40 }
  0xe2   :  { %645 = vmatprep.subr.bf16.mxu1 %v706_v1 }
  0xe5   :  { %646 = vmatpush3.bf16.msra.mxu1 %v681_v41 }
  0xe6   :  { %647 = vmatprep.subr.bf16.mxu1 %v706_v1 }
  0xe9   :  { %648 = vmatpush3.bf16.msra.mxu1 %v682_v50 }
  0xea   :  { %649 = vmatprep.subr.bf16.mxu1 %v706_v1 }
  0xed   :  { %650 = vmatpush3.bf16.msra.mxu1 %v683_v51 }
 0x190   :  { %v215_v25 = vpop.f32.mrf.mxu1 }
 0x191   :  { %v216_v26 = vadd.f32 %v522_v24, %v215_v25 }
 0x192   :  { %v609_v27 = vpop.f32.mrf.mxu1 }
 0x193   :  { %v221_v28 = vmax.f32 %v216_v26, 0.0 }
 0x194   :  { %v218_v29 = vpop.f32.mrf.mxu1 }
 0x195   :  { %v222_v31 = vpack.c.bf16 %v221_v28, %v221_v28 }
 0x196   :  { %v610_v32 = vpop.f32.mrf.mxu1 }
 0x197   :  { %620 = vmatmul.mubr.msk.bf16.vlgmr.msra.gmra.mxu0 %vm262_vm2, %v222_v31 }
 0x198   :  { %624 = vmatpush3.bf16.msra.mxu0 %v672_v30  ;;  %631 = vmatprep.mubr.msk.bf16.mxu0 %vm707_vm0, %v706_v1 }
 0x199   :  { %625 = vmatprep.subr.bf16.mxu0 %v706_v1 }
 0x19c   :  { %626 = vmatpush3.bf16.msra.mxu0 %v673_v33 }
 0x19d   :  { %627 = vmatprep.subr.bf16.mxu0 %v706_v1 }
 0x1a0   :  { %628 = vmatpush3.bf16.msra.mxu0 %v674_v34 }
 0x1a1   :  { %629 = vmatprep.subr.bf16.mxu0 %v706_v1 }
 0x1a4   :  { %630 = vmatpush3.bf16.msra.mxu0 %v675_v35 }
 0x257   :  { %v300_v43 = vpop.f32.mrf.mxu0 }
 0x258   :  { %v301_v44 = vadd.f32 %v531_v42, %v300_v43 }
 0x259   :  { %v621_v45 = vpop.f32.mrf.mxu0 }
 0x25a   :  { %v306_v46 = vmax.f32 %v301_v44, 0.0 }
 0x25b   :  { %v303_v47 = vpop.f32.mrf.mxu0 }
 0x25c   :  { %v307_v48 = vpack.c.bf16 %v306_v46, %v306_v46 }
 0x25d   :  { %v622_v49 = vpop.f32.mrf.mxu0 }
 0x25e   :  { %632 = vmatmul.mubr.msk.bf16.vlgmr.msra.gmra.mxu0 %vm262_vm2, %v307_v48 }
 0x31e   :  { %v384_v53 = vpop.f32.mrf.mxu0 }
 0x31f   :  { %v385_v54 = vadd.f32 %v537_v52, %v384_v53 }
 0x320   :  { %v633_v55 = vpop.f32.mrf.mxu0 }
 0x321   :  { %v390_v56 = vmax.f32 %v385_v54, 0.0 }
 0x322   :  { %v387_v57 = vpop.f32.mrf.mxu0 }
 0x323   :  { %v391_v58 = vpack.c.bf16 %v390_v56, %v390_v56 }
 0x324   :  { %v634_v59 = vpop.f32.mrf.mxu0 }
 0x325   :  { %652 = vmatmul.mubr.bf16.vlgmr.msra.gmra.mxu1 %v391_v58 }
 0x3e5   :  { %v497_v61 = vpop.f32.mrf.mxu1 }
 0x3e6   :  { %v498_v62 = vadd.f32 %v543_v60, %v497_v61 }
 0x3e7   :  { %v653_v63 = vpop.f32.mrf.mxu1 }
 0x3e8   :  { %503 = vst.msk [vmem:[#allocation2] sm:$0xff] %vm64_vm1, %v498_v62 }
 0x3e9   :  { %v500_v0 = vpop.f32.mrf.mxu1 }
 0x3ea   :  { %695 = shalt.err (!%p692_p4)
}
 0x3eb   :  { %513 = dma.vmem_to_hbm [thread:$0]  %s511_s4, 128, %s919_s11, [#allocation3]   ;;  %v654_v1 = vpop.f32.mrf.mxu1 }
 0x3ec   :  { %704 = dma.done.wait [#allocation3], 128  }
 0x3ed   :  { %705 = vsyncadd [#allocation3], 4294967168 }
 0x3ee   :  { %517 = vsyncpa [#allocation3], 1 }

</bundles_post_ra>
